<compile_context>
chip_gen: v6e
topology: v6e:2x2x1
jax: 0.10.0
libtpu: 0.0.40
codegen_flags: <defaults>
</compile_context>

<pallas_src>
import functools

import jax
import jax.numpy as jnp
import numpy as np
from jax.experimental import pallas as pl
from jax.experimental.pallas import tpu as pltpu


# ------------------------------------------------------------------ kernel
def _linear_kernel(x_ref, w_ref, b_ref, o_ref, acc_ref, *, relu):
    """One (tm, tn) output tile; grid axis 2 walks the K dimension."""
    k = pl.program_id(2)

    @pl.when(k == 0)
    def _():
        acc_ref[...] = jnp.zeros_like(acc_ref)

    # MXU matmul, default precision, f32 accumulation.
    acc_ref[...] += jnp.dot(x_ref[...], w_ref[...],
                            preferred_element_type=jnp.float32)

    @pl.when(k == pl.num_programs(2) - 1)
    def _():
        y = acc_ref[...] + b_ref[...]
        if relu:
            y = jnp.maximum(y, 0.0)
        o_ref[...] = y.astype(o_ref.dtype)


# ------------------------------------------------------------------ wrapper
def _pick_tile(dim, cap, align):
    """Largest tile <= cap that is a multiple of `align` and divides `dim`,
    falling back to the full dim (which always satisfies the (8,128) rule)."""
    if dim <= cap:
        return dim
    t = (cap // align) * align
    while t >= align:
        if dim % t == 0:
            return t
        t -= align
    return dim


def linear(x, w, b, *, relu):
    """x: (M, K) f32; w: (K, N) pre-transposed; b: (N,). Returns (M, N) f32."""
    M, K = x.shape
    Kw, N = w.shape
    assert K == Kw, (K, Kw)

    tm = _pick_tile(M, 256, 8)
    tn = _pick_tile(N, 512, 128)
    tk = _pick_tile(K, 512, 128)
    grid = (M // tm, N // tn, K // tk)

    kernel = functools.partial(_linear_kernel, relu=relu)
    return pl.pallas_call(
        kernel,
        out_shape=jax.ShapeDtypeStruct((M, N), jnp.float32),
        grid=grid,
        in_specs=[
            pl.BlockSpec((tm, tk), lambda i, j, k: (i, k)),
            pl.BlockSpec((tk, tn), lambda i, j, k: (k, j)),
            pl.BlockSpec((1, tn), lambda i, j, k: (0, j)),
        ],
        out_specs=pl.BlockSpec((tm, tn), lambda i, j, k: (i, j)),
        scratch_shapes=[pltpu.VMEM((tm, tn), jnp.float32)],
        compiler_params=pltpu.CompilerParams(
            dimension_semantics=("parallel", "parallel", "arbitrary")),
        cost_estimate=pl.CostEstimate(
            flops=2 * M * N * K,
            transcendentals=0,
            bytes_accessed=4 * (M * K + K * N + M * N)),
    )(x, w, b.reshape(1, N))


# ------------------------------------------------------------------ forward
def encoder_forward(params, x, data_dim, latent_dim):
    """Matches Encoder.forward: returns (mu, logvar)."""
    h = x.reshape(-1, data_dim).astype(jnp.float32)
    h = linear(h, *params["fc10"], relu=True)
    h = linear(h, *params["fc11"], relu=True)
    h = linear(h, *params["fc12"], relu=True)
    # fc21 and fc22 fused into one lane-dense GEMM, split afterwards.
    out = linear(h, *params["fc2"], relu=False)
    return out[:, :latent_dim], out[:, latent_dim:]


# ------------------------------------------------------------------ reference
def _reference_forward(params, x, data_dim, latent_dim):
    h = x.reshape(-1, data_dim).astype(jnp.float32)
    for name in ("fc10", "fc11", "fc12"):
        w, b = params[name]
        h = jnp.maximum(h @ w + b, 0.0)
    w, b = params["fc2"]
    out = h @ w + b
    return out[:, :latent_dim], out[:, latent_dim:]


# ------------------------------------------------------------------ params
def init_params(key, data_dim, inner_dim, latent_dim):
    """PyTorch nn.Linear-style init; weights stored pre-transposed (in, out)."""
    def lin(k, fan_in, fan_out):
        kw, kb = jax.random.split(k)
        bound = 1.0 / np.sqrt(fan_in)
        w = jax.random.uniform(kw, (fan_in, fan_out), jnp.float32, -bound, bound)
        b = jax.random.uniform(kb, (fan_out,), jnp.float32, -bound, bound)
        return w, b

    keys = jax.random.split(key, 5)
    params = {
        "fc10": lin(keys[0], data_dim, inner_dim),
        "fc11": lin(keys[1], inner_dim, inner_dim),
        "fc12": lin(keys[2], inner_dim, inner_dim),
    }
    w21, b21 = lin(keys[3], inner_dim, latent_dim)
    w22, b22 = lin(keys[4], inner_dim, latent_dim)
    # Fuse the two heads column-wise: one GEMM of width 2*latent_dim.
    params["fc2"] = (jnp.concatenate([w21, w22], axis=1),
                     jnp.concatenate([b21, b22], axis=0))
    return params


# ------------------------------------------------------------------ main
if __name__ == "__main__":
    key = jax.random.PRNGKey(0)

    batch = 2
    img_shape = (4, 16, 16)                 # flattened by the encoder
    data_dim = int(np.prod(img_shape))      # 1024
    inner_dim = 512                         # small stand-in for the 4096 default
    latent_dim = 64                         # 2*latent_dim = 128 -> lane-dense head

    k_param, k_x = jax.random.split(key)
    params = init_params(k_param, data_dim, inner_dim, latent_dim)
    x = jax.random.normal(k_x, (batch,) + img_shape, jnp.float32)

    mu, logvar = encoder_forward(params, x, data_dim, latent_dim)
    mu = jax.block_until_ready(mu)
    logvar = jax.block_until_ready(logvar)

    ref_mu, ref_lv = _reference_forward(params, x, data_dim, latent_dim)
    ref_mu = jax.block_until_ready(ref_mu)
    ref_lv = jax.block_until_ready(ref_lv)

    np.testing.assert_allclose(np.asarray(mu), np.asarray(ref_mu),
                               rtol=2e-2, atol=2e-2)
    np.testing.assert_allclose(np.asarray(logvar), np.asarray(ref_lv),
                               rtol=2e-2, atol=2e-2)
    assert mu.shape == (batch, latent_dim) and logvar.shape == (batch, latent_dim)

    print("KERNEL_OK")
</pallas_src>

<mosaic_0001>
module attributes {stable_mosaic.version = 11 : i64} {
  func.func @_linear_kernel(%arg0: i32, %arg1: i32, %arg2: i32, %arg3: memref<2x512xf32, #tpu.memory_space<vmem>>, %arg4: memref<512x512xf32, #tpu.memory_space<vmem>>, %arg5: memref<1x512xf32, #tpu.memory_space<vmem>>, %arg6: memref<2x512xf32, #tpu.memory_space<vmem>>, %arg7: memref<2x512xf32, #tpu.memory_space<vmem>>) attributes {dimension_semantics = [#tpu.dimension_semantics<parallel>, #tpu.dimension_semantics<parallel>, #tpu.dimension_semantics<arbitrary>], iteration_bounds = array<i64: 1, 1, 2>, scalar_prefetch = 0 : i64, scratch_operands = 1 : i64, tpu.core_type = #tpu.core_type<tc>, window_params = [{transform_indices = @transform_0, window_bounds = array<i64: 2, 512>}, {transform_indices = @transform_1, window_bounds = array<i64: 512, 512>}, {transform_indices = @transform_2, window_bounds = array<i64: 1, 512>}, {transform_indices = @transform_3, window_bounds = array<i64: 2, 512>}]} {
    %c0_i32 = arith.constant 0 : i32
    %0 = arith.cmpi eq, %arg2, %c0_i32 : i32
    %1 = arith.extui %0 : i1 to i32
    %c0_i32_0 = arith.constant 0 : i32
    %2 = arith.cmpi ne, %1, %c0_i32_0 : i32
    scf.if %2 {
      %cst_9 = arith.constant 0.000000e+00 : f32
      %12 = vector.broadcast %cst_9 : f32 to vector<2x512xf32>
      %c0_10 = arith.constant 0 : index
      %c0_11 = arith.constant 0 : index
      %13 = vector.load %arg7[%c0_10, %c0_11] : memref<2x512xf32, #tpu.memory_space<vmem>>, vector<2x512xf32>
      tpu.vector_store %arg7[%c0_10, %c0_11], %12 {strides = array<i32>} : memref<2x512xf32, #tpu.memory_space<vmem>>, vector<2x512xf32>,
    } else {
    }
    %c0 = arith.constant 0 : index
    %c0_1 = arith.constant 0 : index
    %3 = vector.load %arg7[%c0, %c0_1] : memref<2x512xf32, #tpu.memory_space<vmem>>, vector<2x512xf32>
    %c0_2 = arith.constant 0 : index
    %c0_3 = arith.constant 0 : index
    %4 = vector.load %arg3[%c0_2, %c0_3] : memref<2x512xf32, #tpu.memory_space<vmem>>, vector<2x512xf32>
    %c0_4 = arith.constant 0 : index
    %c0_5 = arith.constant 0 : index
    %5 = vector.load %arg4[%c0_4, %c0_5] : memref<512x512xf32, #tpu.memory_space<vmem>>, vector<512x512xf32>
    %cst = arith.constant dense<0.000000e+00> : vector<2x512xf32>
    %6 = tpu.matmul %4, %5, %cst {dimension_numbers = #tpu.dot_dimension_numbers<[1], [0], [0], [1], [0, 0, 1, 1], [], []>} : vector<2x512xf32>, vector<512x512xf32>, vector<2x512xf32> -> vector<2x512xf32>
    %7 = arith.addf %3, %6 : vector<2x512xf32>
    %c0_6 = arith.constant 0 : index
    %c0_7 = arith.constant 0 : index
    %8 = vector.load %arg7[%c0_6, %c0_7] : memref<2x512xf32, #tpu.memory_space<vmem>>, vector<2x512xf32>
    tpu.vector_store %arg7[%c0_6, %c0_7], %7 {strides = array<i32>} : memref<2x512xf32, #tpu.memory_space<vmem>>, vector<2x512xf32>,
    %c1_i32 = arith.constant 1 : i32
    %9 = arith.cmpi eq, %arg2, %c1_i32 : i32
    %10 = arith.extui %9 : i1 to i32
    %c0_i32_8 = arith.constant 0 : i32
    %11 = arith.cmpi ne, %10, %c0_i32_8 : i32
    scf.if %11 {
      %c0_9 = arith.constant 0 : index
      %c0_10 = arith.constant 0 : index
      %12 = vector.load %arg7[%c0_9, %c0_10] : memref<2x512xf32, #tpu.memory_space<vmem>>, vector<2x512xf32>
      %c0_11 = arith.constant 0 : index
      %c0_12 = arith.constant 0 : index
      %13 = vector.load %arg5[%c0_11, %c0_12] : memref<1x512xf32, #tpu.memory_space<vmem>>, vector<1x512xf32>
      %14 = vector.broadcast %13 : vector<1x512xf32> to vector<2x512xf32>
      %15 = arith.addf %12, %14 : vector<2x512xf32>
      %cst_13 = arith.constant 0.000000e+00 : f32
      %16 = vector.broadcast %cst_13 : f32 to vector<2x512xf32>
      %17 = arith.maximumf %15, %16 : vector<2x512xf32>
      %c0_14 = arith.constant 0 : index
      %c0_15 = arith.constant 0 : index
      %18 = vector.load %arg6[%c0_14, %c0_15] : memref<2x512xf32, #tpu.memory_space<vmem>>, vector<2x512xf32>
      tpu.vector_store %arg6[%c0_14, %c0_15], %17 {strides = array<i32>} : memref<2x512xf32, #tpu.memory_space<vmem>>, vector<2x512xf32>,
    } else {
    }
    return
  }
  func.func @transform_0(%arg0: i32, %arg1: i32, %arg2: i32) -> (i32, i32) {
    %c0_i32 = arith.constant 0 : i32
    return %arg0, %arg2 : i32, i32
  }
  func.func @transform_1(%arg0: i32, %arg1: i32, %arg2: i32) -> (i32, i32) {
    %c0_i32 = arith.constant 0 : i32
    return %arg2, %arg1 : i32, i32
  }
  func.func @transform_2(%arg0: i32, %arg1: i32, %arg2: i32) -> (i32, i32) {
    %c0_i32 = arith.constant 0 : i32
    %c0_i32_0 = arith.constant 0 : i32
    return %c0_i32, %arg1 : i32, i32
  }
  func.func @transform_3(%arg0: i32, %arg1: i32, %arg2: i32) -> (i32, i32) {
    %c0_i32 = arith.constant 0 : i32
    return %arg0, %arg1 : i32, i32
  }
}

</mosaic_0001>

<bundles_post_ra>
// kernel: tpu_custom_call.1
= control target key start
LH: loop header
LB: loop body
LE: loop exit
PB: predicated region body
PF: predicated region fallthrough
CT: control target
= control target key end

     0   :  { %8 = vsyncpa [#allocation4], 0  ;;  %s1803_s0 = inlined_call_operand.hbm [shape: f32[2,1024], index: 0, kind: input, shape index: {}]   ;;  %s1804_s1 = inlined_call_operand.hbm [shape: f32[1024,512], index: 1, kind: input, shape index: {}]   ;;  %s1805_s2 = inlined_call_operand.hbm [shape: f32[1,512], index: 2, kind: input, shape index: {}]   ;;  %s1806_s3 = inlined_call_operand.hbm [shape: f32[2,512], index: 3, kind: output, shape index: {}]  }
   0x1   :  { %10 = vsyncpa [#allocation4 + $0x1], 0 }
   0x2   :  { %11 = vsyncpa [#allocation7], 0 }
   0x3   :  { %13 = vsyncpa [#allocation7 + $0x1], 0 }
   0x4   :  { %14 = vsyncpa [#allocation5], 0  ;;  %s1336_s12 = smov 0   ;;  %s1338_s13 = smov 0  }
   0x5   :  { %s1340_s14 = smov 0   ;;  %s1342_s15 = smov 0  }
   0x6   :  { %s1344_s16 = smov 0   ;;  %s1346_s17 = smov 0  }
   0x7 LB: > { %s1365_s18 = sadd.s32 4294967295, %s1306_s17   ;;  %s48_s19 = sadd.s32 1, %s1294_s14  ;;  %s1306_s17 = sphi %s1346_s17, %s20_s17   ;;  %s1302_s16 = sphi %s1344_s16, %s1824_s16   ;;  %s1298_s15 = sphi %s1342_s15, %s1823_s15   ;;  %s1294_s14 = sphi %s1340_s14, %s1822_s14   ;;  %s1290_s13 = sphi %s1338_s13, %s1821_s13   ;;  %s1286_s12 = sphi %s1336_s12, %s1820_s12  }
   0x8   : > { %p55_p0 = scmp.ne.s32.totalorder %s1294_s14, %s1290_s13  ;;  %p61_p1 = scmp.ne.s32.totalorder %s1290_s13, %s1286_s12 }
   0x9   : > { %p1807_p2 = scmp.eq.s32.totalorder %s1365_s18, 0  ;;  %p1032_p3 = scmp.ge.s32.totalorder %s1306_s17, 1 }
   0xa   : > { %p154_p4 = scmp.lt.s32.totalorder %s1306_s17, 3  ;;  %s1308_s22 = smov [#allocation8]  }
   0xb   : > { %p1376_p5 = por %p1807_p2, %p61_p1  ;;  %s170_s23 = sshll.u32 %s1308_s22, 4  ;;  %s171_s23 = int_to_ptr.vmem [resolvable:$true] %s170_s23 }
   0xc   : > { %p1380_p6 = pnand %p1032_p3, %p154_p4  ;;  %p56_p8 = scmp.eq.s32.totalorder %s1306_s17, 0 }
   0xd   : > { %s1810_s20 = scalar_select %p1376_p5, 1, 0 }
   0xe   : > { %s1811_s21 = scalar_select %p1380_p6, 1, 0 }
   0xf   : > { %p1067_p7 = pneg %p1380_p6  ;;  %s32_s25 = sadd.s32 1, %s1302_s16 }
  0x10   : > { %p1394_p10 = scmp.ge.s32.totalorder %s32_s25, 2  ;;  %p1401_p11 = por %p56_p8, %p55_p0 }
  0x11   : > { %p1389_p9 = pnand %p1067_p7, %p1807_p2  ;;  %p1079_p12 = scmp.lt.s32.totalorder %s1306_s17, 2 }
  0x12   : > { %s1149_s28 = scalar_lea.vmem %s171_s23, 64  ;;  %p1157_p7 = scmp.lt.s32.totalorder %s171_s23, %s171_s23 }
  0x13   : > { %p1140_p13 = pneg %p1389_p9  ;;  %p1150_p1 = scmp.ne.s32.totalorder %s171_s23, %s1149_s28 }
  0x14   : > { %p1158_p2 = scmp.lt.s32.totalorder %s1149_s28, %s1149_s28 }
  0x15   : > { %p1152_p3 = pnand %p1150_p1, %p1140_p13 }
  0x16   : > { %p1159_p5 = por %p1158_p2, %p1157_p7 }
  0x17   : > { %p1153_p4 = pneg %p1152_p3 }
  0x19   : > { %p1160_p6 = pnand %p1159_p5, %p1153_p4 }
  0x1b   : > { %1163 = shalt.err (!%p1160_p6)
}
  0x1c   : > { %1070 = dma.hbm_to_vmem [thread:$0]  (!%p1389_p9), %s1805_s2, 64, %s171_s23, [#allocation7]  }
  0x1d   : > { %s1826_s25 = smov (%p1394_p10, %s32_s25), 0  ;;  %s1418_s4 = sand.u32 1, %s1294_s14  }
  0x1e   : > { %s1052_s5 = sshll.u32 %s1302_s16, 7  ;;  %s44_s6 = ssub.s32 %s1302_s16, %s1826_s25 }
  0x1f   : > { %p46_p0 = scmp.eq.s32.totalorder %s44_s6, 0  ;;  %s1035_s7 = sshll.u32 %s1418_s4, 3 }
  0x20   : > { %s193_s10 = scalar_lea.hbm %s1803_s0, %s1052_s5  ;;  %s185_s12 = scalar_lea.vmem [#allocation3], %s1035_s7 }
  0x21   : > { %s1430_s11 = scalar_select %p46_p0, %s1294_s14, %s48_s19  }
  0x22   : > { %s195_s22 = sshll.u32 %s185_s12, 4  ;;  %p1436_p2 = pnand %p1079_p12, %p1401_p11  ;;  %s196_s22 = int_to_ptr.vmem [resolvable:$true] %s195_s22 }
  0x23   : > { %s1038_s24 = sshll.u32 %s1418_s4, 11  ;;  %s182_s26 = scalar_lea.sflag [#allocation4], %s1418_s4 }
  0x24   : > { %p1166_p5 = pneg %p1436_p2  ;;  %s1177_s28 = scalar_lea.vmem %s196_s22, 128 }
  0x25   : > { %p1178_p6 = scmp.ne.s32.totalorder %s196_s22, %s1177_s28  ;;  %s1309_s19 = smov [#allocation3]  }
  0x26   : > { %s1182_s27 = sshll.u32 %s1309_s19, 4  ;;  %s1183_s27 = int_to_ptr.vmem [resolvable:$false] %s1182_s27 }
  0x27   : > { %p1180_p8 = pnand %p1178_p6, %p1166_p5  ;;  %s1184_s29 = scalar_lea.vmem %s1183_s27, 256 }
  0x28   : > { %p1185_p10 = scmp.lt.s32.totalorder %s196_s22, %s1183_s27  ;;  %p1186_p11 = scmp.lt.s32.totalorder %s1184_s29, %s1177_s28 }
  0x29   : > { %p1181_p9 = pneg %p1180_p8 }
  0x2a   : > { %p1187_p12 = por %p1186_p11, %p1185_p10 }
  0x2c   : > { %p1188_p13 = pnand %p1187_p12, %p1181_p9 }
  0x2e   : > { %1191 = shalt.err (!%p1188_p13)
}
  0x2f   : > { %1074 = dma.hbm_to_vmem [thread:$0]  (!%p1436_p2), %s193_s10, 128, %s196_s22, %s182_s26  }
  0x30   : > { %s1054_s30 = sshll.u32 %s1302_s16, 15  ;;  %s206_s4 = scalar_lea.vmem [#allocation6], %s1038_s24 }
  0x31   : > { %s216_s5 = sshll.u32 %s206_s4, 4  ;;  %s202_s6 = sand.u32 1, %s1306_s17   ;;  %s217_s5 = int_to_ptr.vmem [resolvable:$true] %s216_s5 }
  0x32   : > { %s215_s9 = scalar_lea.hbm %s1804_s1, %s1054_s30  ;;  %s203_s12 = scalar_lea.sflag [#allocation7], %s202_s6 }
  0x33   : > { %s1205_s28 = scalar_lea.vmem %s217_s5, 32768  ;;  %s1310_s19 = smov [#allocation6]  }
  0x34   : > { %p1206_p1 = scmp.ne.s32.totalorder %s217_s5, %s1205_s28  ;;  %s1210_s27 = sshll.u32 %s1310_s19, 4  ;;  %s1211_s27 = int_to_ptr.vmem [resolvable:$false] %s1210_s27 }
  0x35   : > { %s1212_s10 = scalar_lea.vmem %s1211_s27, 65536  ;;  %p1213_p7 = scmp.lt.s32.totalorder %s217_s5, %s1211_s27 }
  0x36   : > { %p1208_p3 = pnand %p1206_p1, %p1166_p5  ;;  %p1214_p0 = scmp.lt.s32.totalorder %s1212_s10, %s1205_s28 }
  0x38   : > { %p1209_p4 = pneg %p1208_p3  ;;  %p1215_p6 = por %p1214_p0, %p1213_p7 }
  0x3a   : > { %p1216_p8 = pnand %p1215_p6, %p1209_p4 }
  0x3c   : > { %1219 = shalt.err (!%p1216_p8)
}
  0x3d   : > { %s1311_s22 = smov 512   ;;  %s1312_s24 = smov 32  }
  0x3e   : > { %1077 = dma.hbm_to_vmem [thread:$0]  (!%p1436_p2), %s215_s9, 32768, %s217_s5, %s203_s12, %s1311_s22, %s1311_s22, %s1312_s24  }
  0x3f   : > { %p1816_p9 = scmp.ne.s32.totalorder %s1811_s21, 0 }
  0x40   : > { %s230_s26 = sand.u32 (!%p1816_p9), 1, %s1290_s13   ;;  %p1817_p5 = scmp.ne.s32.totalorder (!%p1816_p9), %s1810_s20, 0 }
  0x41   : > { %228 = sbr.rel (%p1816_p9) target bundleno = 455 (0x1c7), region = 32  ;;  %s1043_s29 = sshll.u32 (!%p1816_p9), %s230_s26, 3 }
  0x42   : > { %s231_s30 = scalar_lea.sflag (!%p1816_p9), [#allocation4], %s230_s26  ;;  %s1462_s4 = scalar_lea.vmem (!%p1816_p9), [#allocation3], %s1043_s29 }
  0x46   : > { %1269 = dma.done.wait (%p1817_p5), %s231_s30, 128  }
  0x47   : > { %1271 = vsyncadd (%p1817_p5), %s231_s30, 4294967168  ;;  %s239_s6 = sand.u32 1, %s1365_s18   ;;  %s1044_s23 = sshll.u32 %s230_s26, 11 }
  0x48   : > { %s240_s5 = scalar_lea.sflag [#allocation7], %s239_s6  ;;  %s1469_s7 = scalar_lea.vmem [#allocation6], %s1044_s23 }
  0x49   : > { %1273 = dma.done.wait (%p1817_p5), %s240_s5, 32768  }
  0x4a   : > { %1275 = vsyncadd (%p1817_p5), %s240_s5, 4294934528  ;;  %p1818_p2 = scmp.eq.s32.totalorder %s1365_s18, 0 }
  0x4c   : > { %1277 = dma.done.wait (%p1818_p2), [#allocation7], 64   ;;  %p1819_p10 = pmov %p1818_p2 }
  0x4d   : > { %p1046_p11 = scmp.ne.s32.totalorder %s1298_s15, 0 }
  0x4e   : > { %1279 = vsyncadd (%p1819_p10), [#allocation7], 4294967232 }
  0x4f   : > { %278 = sbr.rel (%p1046_p11) target bundleno = 86 (0x56), region = 48 }
  0x54   : > { %v1313_v0 = vmov 0.0  }
  0x55   : > { %279 = vst [vmem:[#allocation2] sm:$0xff] %v1313_v0 }
  0x56 PF: > { %v343_v1 = vld [vmem:[%s1469_s7 + $0x1e8] sm:$0xff]  ;;  %v342_v3 = vld [vmem:[%s1469_s7 + $0x1e0] sm:$0xff]  ;;  %p1047_p12 = scmp.ne.s32.totalorder %s1298_s15, 1 }
  0x57   : > { %v471_v2 = vld [vmem:[%s1469_s7 + $0x5e8] sm:$0xff]  ;;  %560 = vmatprep.subr.mxu0 %v343_v1  ;;  %v470_v4 = vld [vmem:[%s1469_s7 + $0x5e0] sm:$0xff] }
  0x58   : > { %631 = vmatprep.subr.mxu1 %v471_v2  ;;  %v339_v5 = vld [vmem:[%s1469_s7 + $0x1c8] sm:$0xff]  ;;  %561 = vmatpush1.msra.mxu0 %v342_v3  ;;  %v338_v7 = vld [vmem:[%s1469_s7 + $0x1c0] sm:$0xff] }
  0x59   : > { %v467_v6 = vld [vmem:[%s1469_s7 + $0x5c8] sm:$0xff]  ;;  %632 = vmatpush1.msra.mxu1 %v470_v4  ;;  %v466_v8 = vld [vmem:[%s1469_s7 + $0x5c0] sm:$0xff]  ;;  %562 = vmatprep.subr.mxu0 %v339_v5 }
  0x5a   : > { %v335_v9 = vld [vmem:[%s1469_s7 + $0x1a8] sm:$0xff]  ;;  %633 = vmatprep.subr.mxu1 %v467_v6  ;;  %v334_v11 = vld [vmem:[%s1469_s7 + $0x1a0] sm:$0xff]  ;;  %563 = vmatpush1.msra.mxu0 %v338_v7 }
  0x5b   : > { %v463_v10 = vld [vmem:[%s1469_s7 + $0x5a8] sm:$0xff]  ;;  %v462_v12 = vld [vmem:[%s1469_s7 + $0x5a0] sm:$0xff]  ;;  %634 = vmatpush1.msra.mxu1 %v466_v8  ;;  %564 = vmatprep.subr.mxu0 %v335_v9 }
  0x5c   : > { %v331_v13 = vld [vmem:[%s1469_s7 + $0x188] sm:$0xff]  ;;  %635 = vmatprep.subr.mxu1 %v463_v10  ;;  %v330_v15 = vld [vmem:[%s1469_s7 + $0x180] sm:$0xff]  ;;  %565 = vmatpush1.msra.mxu0 %v334_v11 }
  0x5d   : > { %v459_v14 = vld [vmem:[%s1469_s7 + $0x588] sm:$0xff]  ;;  %v458_v16 = vld [vmem:[%s1469_s7 + $0x580] sm:$0xff]  ;;  %636 = vmatpush1.msra.mxu1 %v462_v12  ;;  %566 = vmatprep.subr.mxu0 %v331_v13 }
  0x5e   : > { %v327_v17 = vld [vmem:[%s1469_s7 + $0x168] sm:$0xff]  ;;  %637 = vmatprep.subr.mxu1 %v459_v14  ;;  %v326_v19 = vld [vmem:[%s1469_s7 + $0x160] sm:$0xff]  ;;  %567 = vmatpush1.msra.mxu0 %v330_v15 }
  0x5f   : > { %v455_v18 = vld [vmem:[%s1469_s7 + $0x568] sm:$0xff]  ;;  %v454_v20 = vld [vmem:[%s1469_s7 + $0x560] sm:$0xff]  ;;  %638 = vmatpush1.msra.mxu1 %v458_v16  ;;  %568 = vmatprep.subr.mxu0 %v327_v17 }
  0x60   : > { %v323_v21 = vld [vmem:[%s1469_s7 + $0x148] sm:$0xff]  ;;  %639 = vmatprep.subr.mxu1 %v455_v18  ;;  %v322_v23 = vld [vmem:[%s1469_s7 + $0x140] sm:$0xff]  ;;  %569 = vmatpush1.msra.mxu0 %v326_v19 }
  0x61   : > { %v451_v22 = vld [vmem:[%s1469_s7 + $0x548] sm:$0xff]  ;;  %v450_v24 = vld [vmem:[%s1469_s7 + $0x540] sm:$0xff]  ;;  %640 = vmatpush1.msra.mxu1 %v454_v20  ;;  %570 = vmatprep.subr.mxu0 %v323_v21 }
  0x62   : > { %v319_v25 = vld [vmem:[%s1469_s7 + $0x128] sm:$0xff]  ;;  %641 = vmatprep.subr.mxu1 %v451_v22  ;;  %v318_v27 = vld [vmem:[%s1469_s7 + $0x120] sm:$0xff]  ;;  %571 = vmatpush1.msra.mxu0 %v322_v23 }
  0x63   : > { %v447_v26 = vld [vmem:[%s1469_s7 + $0x528] sm:$0xff]  ;;  %v446_v28 = vld [vmem:[%s1469_s7 + $0x520] sm:$0xff]  ;;  %642 = vmatpush1.msra.mxu1 %v450_v24  ;;  %572 = vmatprep.subr.mxu0 %v319_v25 }
  0x64   : > { %v315_v29 = vld [vmem:[%s1469_s7 + $0x108] sm:$0xff]  ;;  %643 = vmatprep.subr.mxu1 %v447_v26  ;;  %v314_v31 = vld [vmem:[%s1469_s7 + $0x100] sm:$0xff]  ;;  %573 = vmatpush1.msra.mxu0 %v318_v27 }
  0x65   : > { %v443_v30 = vld [vmem:[%s1469_s7 + $0x508] sm:$0xff]  ;;  %v442_v32 = vld [vmem:[%s1469_s7 + $0x500] sm:$0xff]  ;;  %644 = vmatpush1.msra.mxu1 %v446_v28  ;;  %574 = vmatprep.subr.mxu0 %v315_v29 }
  0x66   : > { %v311_v33 = vld [vmem:[%s1469_s7 + $0xe8] sm:$0xff]  ;;  %645 = vmatprep.subr.mxu1 %v443_v30  ;;  %v310_v35 = vld [vmem:[%s1469_s7 + $0xe0] sm:$0xff]  ;;  %575 = vmatpush1.msra.mxu0 %v314_v31  ;;  %v1314_v31 = vmov 1983009808  }
  0x67   : > { %v439_v34 = vld [vmem:[%s1469_s7 + $0x4e8] sm:$0xff]  ;;  %v438_v36 = vld [vmem:[%s1469_s7 + $0x4e0] sm:$0xff]  ;;  %646 = vmatpush1.msra.mxu1 %v442_v32  ;;  %576 = vmatprep.subr.mxu0 %v311_v33  ;;  %v541_v32 = vunpack.c.l.s4 %v1314_v31  ;;  %v543_v33 = vlaneseq  ;;  %v328_v31 = vld [vmem:[%s1469_s7 + $0x170] sm:$0xff] }
  0x68   : > { %v307_v37 = vld [vmem:[%s1469_s7 + $0xc8] sm:$0xff]  ;;  %647 = vmatprep.subr.mxu1 %v439_v34  ;;  %v306_v39 = vld [vmem:[%s1469_s7 + $0xc0] sm:$0xff]  ;;  %577 = vmatpush1.msra.mxu0 %v310_v35 }
  0x69   : > { %v435_v38 = vld [vmem:[%s1469_s7 + $0x4c8] sm:$0xff]  ;;  %v434_v40 = vld [vmem:[%s1469_s7 + $0x4c0] sm:$0xff]  ;;  %648 = vmatpush1.msra.mxu1 %v438_v36  ;;  %578 = vmatprep.subr.mxu0 %v307_v37 }
  0x6a   : > { %v303_v41 = vld [vmem:[%s1469_s7 + $0xa8] sm:$0xff]  ;;  %649 = vmatprep.subr.mxu1 %v435_v38  ;;  %v302_v43 = vld [vmem:[%s1469_s7 + $0xa0] sm:$0xff]  ;;  %579 = vmatpush1.msra.mxu0 %v306_v39 }
  0x6b   : > { %v431_v42 = vld [vmem:[%s1469_s7 + $0x4a8] sm:$0xff]  ;;  %v430_v44 = vld [vmem:[%s1469_s7 + $0x4a0] sm:$0xff]  ;;  %650 = vmatpush1.msra.mxu1 %v434_v40  ;;  %580 = vmatprep.subr.mxu0 %v303_v41 }
  0x6c   : > { %v299_v45 = vld [vmem:[%s1469_s7 + $0x88] sm:$0xff]  ;;  %651 = vmatprep.subr.mxu1 %v431_v42  ;;  %v298_v47 = vld [vmem:[%s1469_s7 + $0x80] sm:$0xff]  ;;  %581 = vmatpush1.msra.mxu0 %v302_v43  ;;  %v542_v42 = vunpack.c.0.s8 %v541_v32  ;;  %v1582_v43 = vshrl.u32 %v543_v33, 7  ;;  %v456_v32 = vld [vmem:[%s1469_s7 + $0x570] sm:$0xff] }
  0x6d   : > { %v427_v46 = vld [vmem:[%s1469_s7 + $0x488] sm:$0xff]  ;;  %v426_v48 = vld [vmem:[%s1469_s7 + $0x480] sm:$0xff]  ;;  %652 = vmatpush1.msra.mxu1 %v430_v44  ;;  %582 = vmatprep.subr.mxu0 %v299_v45  ;;  %v325_v33 = vld [vmem:[%s1469_s7 + $0x158] sm:$0xff] }
  0x6e   : > { %v295_v49 = vld [vmem:[%s1469_s7 + $0x68] sm:$0xff]  ;;  %653 = vmatprep.subr.mxu1 %v427_v46  ;;  %v294_v51 = vld [vmem:[%s1469_s7 + $0x60] sm:$0xff]  ;;  %583 = vmatpush1.msra.mxu0 %v298_v47 }
  0x6f   : > { %v423_v50 = vld [vmem:[%s1469_s7 + $0x468] sm:$0xff]  ;;  %v422_v52 = vld [vmem:[%s1469_s7 + $0x460] sm:$0xff]  ;;  %654 = vmatpush1.msra.mxu1 %v426_v48  ;;  %584 = vmatprep.subr.mxu0 %v295_v49  ;;  %v281_v48 = vld [vmem:[%s1462_s4] sm:$0xff] }
  0x70   : > { %v291_v53 = vld [vmem:[%s1469_s7 + $0x48] sm:$0xff]  ;;  %655 = vmatprep.subr.mxu1 %v423_v50  ;;  %v290_v55 = vld [vmem:[%s1469_s7 + $0x40] sm:$0xff]  ;;  %585 = vmatpush1.msra.mxu0 %v294_v51 }
  0x71   : > { %v419_v54 = vld [vmem:[%s1469_s7 + $0x448] sm:$0xff]  ;;  %v418_v56 = vld [vmem:[%s1469_s7 + $0x440] sm:$0xff]  ;;  %656 = vmatpush1.msra.mxu1 %v422_v52  ;;  %586 = vmatprep.subr.mxu0 %v291_v53  ;;  %v1594_v53 = vsub.s32 %v542_v42, %v1582_v43  ;;  %v445_v42 = vld [vmem:[%s1469_s7 + $0x518] sm:$0xff] }
  0x72   : > { %v287_v57 = vld [vmem:[%s1469_s7 + $0x28] sm:$0xff]  ;;  %657 = vmatprep.subr.mxu1 %v419_v54  ;;  %v286_v59 = vld [vmem:[%s1469_s7 + $0x20] sm:$0xff]  ;;  %587 = vmatpush1.msra.mxu0 %v290_v55 }
  0x73   : > { %v415_v58 = vld [vmem:[%s1469_s7 + $0x428] sm:$0xff]  ;;  %v414_v60 = vld [vmem:[%s1469_s7 + $0x420] sm:$0xff]  ;;  %658 = vmatpush1.msra.mxu1 %v418_v56  ;;  %588 = vmatprep.subr.mxu0 %v287_v57  ;;  %v539_v56 = vcombine.high %v281_v48, %v281_v48 }
  0x74   : > { %v283_v61 = vld [vmem:[%s1469_s7 + $0x8] sm:$0xff]  ;;  %659 = vmatprep.subr.mxu1 %v415_v58  ;;  %v282_v63 = vld [vmem:[%s1469_s7] sm:$0xff]  ;;  %589 = vmatpush1.msra.mxu0 %v286_v59 }
  0x75   : > { %v411_v62 = vld [vmem:[%s1469_s7 + $0x408] sm:$0xff]  ;;  %v410_v0 = vld [vmem:[%s1469_s7 + $0x400] sm:$0xff]  ;;  %660 = vmatpush1.msra.mxu1 %v414_v60  ;;  %590 = vmatprep.subr.mxu0 %v283_v61 }
  0x76   : > { %v407_v1 = vld [vmem:[%s1469_s7 + $0x3e8] sm:$0xff]  ;;  %661 = vmatprep.subr.mxu1 %v411_v62  ;;  %v406_v3 = vld [vmem:[%s1469_s7 + $0x3e0] sm:$0xff]  ;;  %591 = vmatpush1.msra.mxu0 %v282_v63  ;;  %v1605_v63 = vrot.slane %v281_v48, %v1594_v53  ;;  %v312_v48 = vld [vmem:[%s1469_s7 + $0xf0] sm:$0xff] }
  0x77   : > { %v535_v2 = vld [vmem:[%s1469_s7 + $0x7e8] sm:$0xff]  ;;  %v534_v4 = vld [vmem:[%s1469_s7 + $0x7e0] sm:$0xff]  ;;  %662 = vmatpush1.msra.mxu1 %v410_v0  ;;  %592 = vmatprep.subr.mxu0 %v407_v1 }
  0x78   : > { %v403_v5 = vld [vmem:[%s1469_s7 + $0x3c8] sm:$0xff]  ;;  %663 = vmatprep.subr.mxu1 %v535_v2  ;;  %v402_v7 = vld [vmem:[%s1469_s7 + $0x3c0] sm:$0xff]  ;;  %593 = vmatpush2.msra.mxu0 %v406_v3  ;;  %v1610_v2 = vrot.slane %v539_v56, %v1594_v53  ;;  %v433_v56 = vld [vmem:[%s1469_s7 + $0x4b8] sm:$0xff] }
  0x79   : > { %v531_v6 = vld [vmem:[%s1469_s7 + $0x7c8] sm:$0xff]  ;;  %v530_v8 = vld [vmem:[%s1469_s7 + $0x7c0] sm:$0xff]  ;;  %664 = vmatpush2.msra.mxu1 %v534_v4  ;;  %594 = vmatprep.subr.mxu0 %v403_v5 }
  0x7a   : > { %v399_v9 = vld [vmem:[%s1469_s7 + $0x3a8] sm:$0xff]  ;;  %665 = vmatprep.subr.mxu1 %v531_v6  ;;  %v398_v11 = vld [vmem:[%s1469_s7 + $0x3a0] sm:$0xff]  ;;  %595 = vmatpush2.msra.mxu0 %v402_v7 }
  0x7b   : > { %v527_v10 = vld [vmem:[%s1469_s7 + $0x7a8] sm:$0xff]  ;;  %v526_v12 = vld [vmem:[%s1469_s7 + $0x7a0] sm:$0xff]  ;;  %666 = vmatpush2.msra.mxu1 %v530_v8  ;;  %596 = vmatprep.subr.mxu0 %v399_v9  ;;  %v1620_v9 = vcombine.high %v1605_v63, %v1605_v63 }
  0x7c   : > { %v395_v13 = vld [vmem:[%s1469_s7 + $0x388] sm:$0xff]  ;;  %667 = vmatprep.subr.mxu1 %v527_v10  ;;  %v394_v15 = vld [vmem:[%s1469_s7 + $0x380] sm:$0xff]  ;;  %597 = vmatpush2.msra.mxu0 %v398_v11  ;;  %v1625_v11 = vcombine.high %v1610_v2, %v1610_v2 }
  0x7d   : > { %v523_v14 = vld [vmem:[%s1469_s7 + $0x788] sm:$0xff]  ;;  %v522_v16 = vld [vmem:[%s1469_s7 + $0x780] sm:$0xff]  ;;  %668 = vmatpush2.msra.mxu1 %v526_v12  ;;  %598 = vmatprep.subr.mxu0 %v395_v13  ;;  %v345_v13 = vld [vmem:[%s1469_s7 + $0x1f8] sm:$0xff] }
  0x7e   : > { %v391_v17 = vld [vmem:[%s1469_s7 + $0x368] sm:$0xff]  ;;  %669 = vmatprep.subr.mxu1 %v523_v14  ;;  %v390_v19 = vld [vmem:[%s1469_s7 + $0x360] sm:$0xff]  ;;  %599 = vmatpush2.msra.mxu0 %v394_v15  ;;  %v473_v14 = vld [vmem:[%s1469_s7 + $0x5f8] sm:$0xff] }
  0x7f   : > { %v519_v18 = vld [vmem:[%s1469_s7 + $0x768] sm:$0xff]  ;;  %v518_v20 = vld [vmem:[%s1469_s7 + $0x760] sm:$0xff]  ;;  %670 = vmatpush2.msra.mxu1 %v522_v16  ;;  %600 = vmatprep.subr.mxu0 %v391_v17  ;;  %v344_v15 = vld [vmem:[%s1469_s7 + $0x1f0] sm:$0xff] }
  0x80   : > { %v387_v21 = vld [vmem:[%s1469_s7 + $0x348] sm:$0xff]  ;;  %671 = vmatprep.subr.mxu1 %v519_v18  ;;  %v386_v23 = vld [vmem:[%s1469_s7 + $0x340] sm:$0xff]  ;;  %601 = vmatpush2.msra.mxu0 %v390_v19  ;;  %v472_v16 = vld [vmem:[%s1469_s7 + $0x5f0] sm:$0xff] }
  0x81   : > { %v515_v22 = vld [vmem:[%s1469_s7 + $0x748] sm:$0xff]  ;;  %v514_v24 = vld [vmem:[%s1469_s7 + $0x740] sm:$0xff]  ;;  %672 = vmatpush2.msra.mxu1 %v518_v20  ;;  %602 = vmatprep.subr.mxu0 %v387_v21  ;;  %v341_v17 = vld [vmem:[%s1469_s7 + $0x1d8] sm:$0xff] }
  0x82   : > { %v383_v25 = vld [vmem:[%s1469_s7 + $0x328] sm:$0xff]  ;;  %673 = vmatprep.subr.mxu1 %v515_v22  ;;  %v382_v27 = vld [vmem:[%s1469_s7 + $0x320] sm:$0xff]  ;;  %603 = vmatpush2.msra.mxu0 %v386_v23  ;;  %v469_v18 = vld [vmem:[%s1469_s7 + $0x5d8] sm:$0xff] }
  0x83   : > { %v511_v26 = vld [vmem:[%s1469_s7 + $0x728] sm:$0xff]  ;;  %v510_v28 = vld [vmem:[%s1469_s7 + $0x720] sm:$0xff]  ;;  %674 = vmatpush2.msra.mxu1 %v514_v24  ;;  %604 = vmatprep.subr.mxu0 %v383_v25  ;;  %v340_v19 = vld [vmem:[%s1469_s7 + $0x1d0] sm:$0xff] }
  0x84   : > { %v379_v29 = vld [vmem:[%s1469_s7 + $0x308] sm:$0xff]  ;;  %675 = vmatprep.subr.mxu1 %v511_v26  ;;  %v378_v34 = vld [vmem:[%s1469_s7 + $0x300] sm:$0xff]  ;;  %605 = vmatpush2.msra.mxu0 %v382_v27  ;;  %v468_v20 = vld [vmem:[%s1469_s7 + $0x5d0] sm:$0xff] }
  0x85   : > { %v507_v30 = vld [vmem:[%s1469_s7 + $0x708] sm:$0xff]  ;;  %v506_v35 = vld [vmem:[%s1469_s7 + $0x700] sm:$0xff]  ;;  %676 = vmatpush2.msra.mxu1 %v510_v28  ;;  %606 = vmatprep.subr.mxu0 %v379_v29  ;;  %v337_v21 = vld [vmem:[%s1469_s7 + $0x1b8] sm:$0xff] }
  0x86   : > { %v375_v36 = vld [vmem:[%s1469_s7 + $0x2e8] sm:$0xff]  ;;  %677 = vmatprep.subr.mxu1 %v507_v30  ;;  %v374_v38 = vld [vmem:[%s1469_s7 + $0x2e0] sm:$0xff]  ;;  %607 = vmatpush2.msra.mxu0 %v378_v34  ;;  %v465_v22 = vld [vmem:[%s1469_s7 + $0x5b8] sm:$0xff] }
  0x87   : > { %v503_v37 = vld [vmem:[%s1469_s7 + $0x6e8] sm:$0xff]  ;;  %v502_v39 = vld [vmem:[%s1469_s7 + $0x6e0] sm:$0xff]  ;;  %678 = vmatpush2.msra.mxu1 %v506_v35  ;;  %608 = vmatprep.subr.mxu0 %v375_v36  ;;  %v336_v23 = vld [vmem:[%s1469_s7 + $0x1b0] sm:$0xff] }
  0x88   : > { %v371_v40 = vld [vmem:[%s1469_s7 + $0x2c8] sm:$0xff]  ;;  %679 = vmatprep.subr.mxu1 %v503_v37  ;;  %v370_v44 = vld [vmem:[%s1469_s7 + $0x2c0] sm:$0xff]  ;;  %609 = vmatpush2.msra.mxu0 %v374_v38  ;;  %v464_v24 = vld [vmem:[%s1469_s7 + $0x5b0] sm:$0xff] }
  0x89   : > { %v499_v41 = vld [vmem:[%s1469_s7 + $0x6c8] sm:$0xff]  ;;  %v498_v45 = vld [vmem:[%s1469_s7 + $0x6c0] sm:$0xff]  ;;  %680 = vmatpush2.msra.mxu1 %v502_v39  ;;  %610 = vmatprep.subr.mxu0 %v371_v40  ;;  %v333_v25 = vld [vmem:[%s1469_s7 + $0x198] sm:$0xff] }
  0x8a   : > { %v367_v46 = vld [vmem:[%s1469_s7 + $0x2a8] sm:$0xff]  ;;  %681 = vmatprep.subr.mxu1 %v499_v41  ;;  %v366_v49 = vld [vmem:[%s1469_s7 + $0x2a0] sm:$0xff]  ;;  %611 = vmatpush2.msra.mxu0 %v370_v44  ;;  %v461_v26 = vld [vmem:[%s1469_s7 + $0x598] sm:$0xff] }
  0x8b   : > { %v495_v47 = vld [vmem:[%s1469_s7 + $0x6a8] sm:$0xff]  ;;  %v494_v50 = vld [vmem:[%s1469_s7 + $0x6a0] sm:$0xff]  ;;  %682 = vmatpush2.msra.mxu1 %v498_v45  ;;  %612 = vmatprep.subr.mxu0 %v367_v46  ;;  %v332_v27 = vld [vmem:[%s1469_s7 + $0x190] sm:$0xff] }
  0x8c   : > { %v363_v51 = vld [vmem:[%s1469_s7 + $0x288] sm:$0xff]  ;;  %683 = vmatprep.subr.mxu1 %v495_v47  ;;  %v362_v54 = vld [vmem:[%s1469_s7 + $0x280] sm:$0xff]  ;;  %613 = vmatpush2.msra.mxu0 %v366_v49  ;;  %v460_v28 = vld [vmem:[%s1469_s7 + $0x590] sm:$0xff] }
  0x8d   : > { %v491_v52 = vld [vmem:[%s1469_s7 + $0x688] sm:$0xff]  ;;  %v490_v55 = vld [vmem:[%s1469_s7 + $0x680] sm:$0xff]  ;;  %684 = vmatpush2.msra.mxu1 %v494_v50  ;;  %614 = vmatprep.subr.mxu0 %v363_v51  ;;  %v329_v29 = vld [vmem:[%s1469_s7 + $0x178] sm:$0xff] }
  0x8e   : > { %v359_v57 = vld [vmem:[%s1469_s7 + $0x268] sm:$0xff]  ;;  %685 = vmatprep.subr.mxu1 %v491_v52  ;;  %v358_v59 = vld [vmem:[%s1469_s7 + $0x260] sm:$0xff]  ;;  %615 = vmatpush2.msra.mxu0 %v362_v54  ;;  %v457_v30 = vld [vmem:[%s1469_s7 + $0x578] sm:$0xff] }
  0x8f   : > { %v487_v58 = vld [vmem:[%s1469_s7 + $0x668] sm:$0xff]  ;;  %v486_v60 = vld [vmem:[%s1469_s7 + $0x660] sm:$0xff]  ;;  %686 = vmatpush2.msra.mxu1 %v490_v55  ;;  %616 = vmatprep.subr.mxu0 %v359_v57  ;;  %v453_v34 = vld [vmem:[%s1469_s7 + $0x558] sm:$0xff] }
  0x90   : > { %v355_v61 = vld [vmem:[%s1469_s7 + $0x248] sm:$0xff]  ;;  %687 = vmatprep.subr.mxu1 %v487_v58  ;;  %v354_v0 = vld [vmem:[%s1469_s7 + $0x240] sm:$0xff]  ;;  %617 = vmatpush2.msra.mxu0 %v358_v59  ;;  %v324_v35 = vld [vmem:[%s1469_s7 + $0x150] sm:$0xff] }
  0x91   : > { %v483_v62 = vld [vmem:[%s1469_s7 + $0x648] sm:$0xff]  ;;  %v482_v1 = vld [vmem:[%s1469_s7 + $0x640] sm:$0xff]  ;;  %688 = vmatpush2.msra.mxu1 %v486_v60  ;;  %618 = vmatprep.subr.mxu0 %v355_v61  ;;  %v452_v36 = vld [vmem:[%s1469_s7 + $0x550] sm:$0xff] }
  0x92   : > { %v351_v3 = vld [vmem:[%s1469_s7 + $0x228] sm:$0xff]  ;;  %689 = vmatprep.subr.mxu1 %v483_v62  ;;  %v350_v5 = vld [vmem:[%s1469_s7 + $0x220] sm:$0xff]  ;;  %619 = vmatpush2.msra.mxu0 %v354_v0  ;;  %v321_v37 = vld [vmem:[%s1469_s7 + $0x138] sm:$0xff] }
  0x93   : > { %v479_v4 = vld [vmem:[%s1469_s7 + $0x628] sm:$0xff]  ;;  %v478_v6 = vld [vmem:[%s1469_s7 + $0x620] sm:$0xff]  ;;  %690 = vmatpush2.msra.mxu1 %v482_v1  ;;  %620 = vmatprep.subr.mxu0 %v351_v3  ;;  %v449_v38 = vld [vmem:[%s1469_s7 + $0x538] sm:$0xff] }
  0x94   : > { %v347_v7 = vld [vmem:[%s1469_s7 + $0x208] sm:$0xff]  ;;  %691 = vmatprep.subr.mxu1 %v479_v4  ;;  %v346_v10 = vld [vmem:[%s1469_s7 + $0x200] sm:$0xff]  ;;  %621 = vmatpush2.msra.mxu0 %v350_v5  ;;  %v320_v39 = vld [vmem:[%s1469_s7 + $0x130] sm:$0xff] }
  0x95   : > { %v475_v8 = vld [vmem:[%s1469_s7 + $0x608] sm:$0xff]  ;;  %692 = vmatpush2.msra.mxu1 %v478_v6  ;;  %v474_v12 = vld [vmem:[%s1469_s7 + $0x600] sm:$0xff]  ;;  %622 = vmatprep.subr.mxu0 %v347_v7  ;;  %v448_v40 = vld [vmem:[%s1469_s7 + $0x530] sm:$0xff] }
  0x96   : > { %693 = vmatprep.subr.mxu1 %v475_v8  ;;  %623 = vmatpush2.msra.mxu0 %v346_v10  ;;  %v317_v41 = vld [vmem:[%s1469_s7 + $0x118] sm:$0xff]  ;;  %v316_v44 = vld [vmem:[%s1469_s7 + $0x110] sm:$0xff] }
  0x97   : > { %624 = vmatprep.mubr.f32.mxu0 %v1620_v9  ;;  %694 = vmatpush2.msra.mxu1 %v474_v12  ;;  %v444_v45 = vld [vmem:[%s1469_s7 + $0x510] sm:$0xff]  ;;  %v313_v46 = vld [vmem:[%s1469_s7 + $0xf8] sm:$0xff] }
  0x98   : > { %695 = vmatprep.mubr.f32.mxu1 %v1625_v11  ;;  %625 = vmatmul.mubr.f32.vlgmr.msra.gmra.mxu0 %v1605_v63  ;;  %v441_v47 = vld [vmem:[%s1469_s7 + $0x4f8] sm:$0xff]  ;;  %v440_v49 = vld [vmem:[%s1469_s7 + $0x4f0] sm:$0xff] }
  0x99   : > { %696 = vmatmul.mubr.f32.vlgmr.msra.gmra.mxu1 %v1610_v2  ;;  %702 = vmatprep.subr.mxu0 %v345_v13  ;;  %v309_v50 = vld [vmem:[%s1469_s7 + $0xd8] sm:$0xff]  ;;  %v308_v52 = vld [vmem:[%s1469_s7 + $0xd0] sm:$0xff] }
  0x9a   : > { %773 = vmatprep.subr.mxu1 %v473_v14  ;;  %703 = vmatpush1.msra.mxu0 %v344_v15  ;;  %v437_v51 = vld [vmem:[%s1469_s7 + $0x4d8] sm:$0xff]  ;;  %v436_v54 = vld [vmem:[%s1469_s7 + $0x4d0] sm:$0xff] }
  0x9b   : > { %774 = vmatpush1.msra.mxu1 %v472_v16  ;;  %704 = vmatprep.subr.mxu0 %v341_v17  ;;  %v305_v55 = vld [vmem:[%s1469_s7 + $0xb8] sm:$0xff]  ;;  %v304_v57 = vld [vmem:[%s1469_s7 + $0xb0] sm:$0xff] }
  0x9c   : > { %775 = vmatprep.subr.mxu1 %v469_v18  ;;  %705 = vmatpush1.msra.mxu0 %v340_v19  ;;  %v432_v58 = vld [vmem:[%s1469_s7 + $0x4b0] sm:$0xff]  ;;  %v301_v59 = vld [vmem:[%s1469_s7 + $0x98] sm:$0xff] }
  0x9d   : > { %776 = vmatpush1.msra.mxu1 %v468_v20  ;;  %706 = vmatprep.subr.mxu0 %v337_v21  ;;  %v429_v60 = vld [vmem:[%s1469_s7 + $0x498] sm:$0xff]  ;;  %v300_v61 = vld [vmem:[%s1469_s7 + $0x90] sm:$0xff] }
  0x9e   : > { %777 = vmatprep.subr.mxu1 %v465_v22  ;;  %707 = vmatpush1.msra.mxu0 %v336_v23  ;;  %v428_v62 = vld [vmem:[%s1469_s7 + $0x490] sm:$0xff]  ;;  %v297_v0 = vld [vmem:[%s1469_s7 + $0x78] sm:$0xff] }
  0x9f   : > { %778 = vmatpush1.msra.mxu1 %v464_v24  ;;  %708 = vmatprep.subr.mxu0 %v333_v25  ;;  %v425_v1 = vld [vmem:[%s1469_s7 + $0x478] sm:$0xff]  ;;  %v296_v3 = vld [vmem:[%s1469_s7 + $0x70] sm:$0xff] }
  0xa0   : > { %779 = vmatprep.subr.mxu1 %v461_v26  ;;  %709 = vmatpush1.msra.mxu0 %v332_v27  ;;  %v424_v4 = vld [vmem:[%s1469_s7 + $0x470] sm:$0xff]  ;;  %v293_v5 = vld [vmem:[%s1469_s7 + $0x58] sm:$0xff] }
  0xa1   : > { %780 = vmatpush1.msra.mxu1 %v460_v28  ;;  %710 = vmatprep.subr.mxu0 %v329_v29  ;;  %v421_v6 = vld [vmem:[%s1469_s7 + $0x458] sm:$0xff]  ;;  %v292_v7 = vld [vmem:[%s1469_s7 + $0x50] sm:$0xff] }
  0xa2   : > { %781 = vmatprep.subr.mxu1 %v457_v30  ;;  %711 = vmatpush1.msra.mxu0 %v328_v31  ;;  %v420_v8 = vld [vmem:[%s1469_s7 + $0x450] sm:$0xff]  ;;  %v289_v10 = vld [vmem:[%s1469_s7 + $0x38] sm:$0xff] }
  0xa3   : > { %782 = vmatpush1.msra.mxu1 %v456_v32  ;;  %712 = vmatprep.subr.mxu0 %v325_v33  ;;  %v417_v12 = vld [vmem:[%s1469_s7 + $0x438] sm:$0xff]  ;;  %v288_v13 = vld [vmem:[%s1469_s7 + $0x30] sm:$0xff] }
  0xa4   : > { %783 = vmatprep.subr.mxu1 %v453_v34  ;;  %713 = vmatpush1.msra.mxu0 %v324_v35  ;;  %v416_v14 = vld [vmem:[%s1469_s7 + $0x430] sm:$0xff]  ;;  %v285_v15 = vld [vmem:[%s1469_s7 + $0x18] sm:$0xff] }
  0xa5   : > { %784 = vmatpush1.msra.mxu1 %v452_v36  ;;  %714 = vmatprep.subr.mxu0 %v321_v37  ;;  %v413_v16 = vld [vmem:[%s1469_s7 + $0x418] sm:$0xff]  ;;  %v284_v17 = vld [vmem:[%s1469_s7 + $0x10] sm:$0xff] }
  0xa6   : > { %785 = vmatprep.subr.mxu1 %v449_v38  ;;  %715 = vmatpush1.msra.mxu0 %v320_v39  ;;  %v412_v18 = vld [vmem:[%s1469_s7 + $0x410] sm:$0xff]  ;;  %v409_v19 = vld [vmem:[%s1469_s7 + $0x3f8] sm:$0xff] }
  0xa7   : > { %786 = vmatpush1.msra.mxu1 %v448_v40  ;;  %716 = vmatprep.subr.mxu0 %v317_v41  ;;  %v537_v20 = vld [vmem:[%s1469_s7 + $0x7f8] sm:$0xff]  ;;  %v408_v21 = vld [vmem:[%s1469_s7 + $0x3f0] sm:$0xff] }
  0xa8   : > { %787 = vmatprep.subr.mxu1 %v445_v42  ;;  %717 = vmatpush1.msra.mxu0 %v316_v44  ;;  %v536_v22 = vld [vmem:[%s1469_s7 + $0x7f0] sm:$0xff]  ;;  %v405_v23 = vld [vmem:[%s1469_s7 + $0x3d8] sm:$0xff] }
  0xa9   : > { %788 = vmatpush1.msra.mxu1 %v444_v45  ;;  %718 = vmatprep.subr.mxu0 %v313_v46  ;;  %v533_v24 = vld [vmem:[%s1469_s7 + $0x7d8] sm:$0xff]  ;;  %v404_v25 = vld [vmem:[%s1469_s7 + $0x3d0] sm:$0xff] }
  0xaa   : > { %789 = vmatprep.subr.mxu1 %v441_v47  ;;  %719 = vmatpush1.msra.mxu0 %v312_v48  ;;  %v532_v26 = vld [vmem:[%s1469_s7 + $0x7d0] sm:$0xff]  ;;  %v401_v27 = vld [vmem:[%s1469_s7 + $0x3b8] sm:$0xff] }
  0xab   : > { %790 = vmatpush1.msra.mxu1 %v440_v49  ;;  %720 = vmatprep.subr.mxu0 %v309_v50  ;;  %v529_v28 = vld [vmem:[%s1469_s7 + $0x7b8] sm:$0xff]  ;;  %v400_v29 = vld [vmem:[%s1469_s7 + $0x3b0] sm:$0xff] }
  0xac   : > { %791 = vmatprep.subr.mxu1 %v437_v51  ;;  %721 = vmatpush1.msra.mxu0 %v308_v52  ;;  %v528_v30 = vld [vmem:[%s1469_s7 + $0x7b0] sm:$0xff]  ;;  %v397_v31 = vld [vmem:[%s1469_s7 + $0x398] sm:$0xff] }
  0xad   : > { %792 = vmatpush1.msra.mxu1 %v436_v54  ;;  %722 = vmatprep.subr.mxu0 %v305_v55  ;;  %v525_v32 = vld [vmem:[%s1469_s7 + $0x798] sm:$0xff]  ;;  %v396_v33 = vld [vmem:[%s1469_s7 + $0x390] sm:$0xff] }
  0xae   : > { %793 = vmatprep.subr.mxu1 %v433_v56  ;;  %723 = vmatpush1.msra.mxu0 %v304_v57  ;;  %v524_v34 = vld [vmem:[%s1469_s7 + $0x790] sm:$0xff]  ;;  %v393_v35 = vld [vmem:[%s1469_s7 + $0x378] sm:$0xff] }
  0xaf   : > { %794 = vmatpush1.msra.mxu1 %v432_v58  ;;  %724 = vmatprep.subr.mxu0 %v301_v59  ;;  %v521_v36 = vld [vmem:[%s1469_s7 + $0x778] sm:$0xff]  ;;  %v392_v37 = vld [vmem:[%s1469_s7 + $0x370] sm:$0xff] }
  0xb0   : > { %795 = vmatprep.subr.mxu1 %v429_v60  ;;  %725 = vmatpush1.msra.mxu0 %v300_v61  ;;  %v520_v38 = vld [vmem:[%s1469_s7 + $0x770] sm:$0xff]  ;;  %v389_v39 = vld [vmem:[%s1469_s7 + $0x358] sm:$0xff] }
  0xb1   : > { %796 = vmatpush1.msra.mxu1 %v428_v62  ;;  %726 = vmatprep.subr.mxu0 %v297_v0  ;;  %v517_v40 = vld [vmem:[%s1469_s7 + $0x758] sm:$0xff]  ;;  %v388_v41 = vld [vmem:[%s1469_s7 + $0x350] sm:$0xff] }
  0xb2   : > { %797 = vmatprep.subr.mxu1 %v425_v1  ;;  %727 = vmatpush1.msra.mxu0 %v296_v3  ;;  %v516_v42 = vld [vmem:[%s1469_s7 + $0x750] sm:$0xff]  ;;  %v385_v44 = vld [vmem:[%s1469_s7 + $0x338] sm:$0xff] }
  0xb3   : > { %798 = vmatpush1.msra.mxu1 %v424_v4  ;;  %728 = vmatprep.subr.mxu0 %v293_v5  ;;  %v513_v45 = vld [vmem:[%s1469_s7 + $0x738] sm:$0xff]  ;;  %v384_v46 = vld [vmem:[%s1469_s7 + $0x330] sm:$0xff] }
  0xb4   : > { %799 = vmatprep.subr.mxu1 %v421_v6  ;;  %729 = vmatpush1.msra.mxu0 %v292_v7  ;;  %v512_v47 = vld [vmem:[%s1469_s7 + $0x730] sm:$0xff]  ;;  %v381_v48 = vld [vmem:[%s1469_s7 + $0x318] sm:$0xff] }
  0xb5   : > { %800 = vmatpush1.msra.mxu1 %v420_v8  ;;  %730 = vmatprep.subr.mxu0 %v289_v10  ;;  %v509_v49 = vld [vmem:[%s1469_s7 + $0x718] sm:$0xff]  ;;  %v380_v50 = vld [vmem:[%s1469_s7 + $0x310] sm:$0xff] }
  0xb6   : > { %801 = vmatprep.subr.mxu1 %v417_v12  ;;  %731 = vmatpush1.msra.mxu0 %v288_v13  ;;  %v508_v51 = vld [vmem:[%s1469_s7 + $0x710] sm:$0xff]  ;;  %v377_v52 = vld [vmem:[%s1469_s7 + $0x2f8] sm:$0xff] }
  0xb7   : > { %802 = vmatpush1.msra.mxu1 %v416_v14  ;;  %732 = vmatprep.subr.mxu0 %v285_v15  ;;  %v505_v54 = vld [vmem:[%s1469_s7 + $0x6f8] sm:$0xff]  ;;  %v376_v55 = vld [vmem:[%s1469_s7 + $0x2f0] sm:$0xff] }
  0xb8   : > { %803 = vmatprep.subr.mxu1 %v413_v16  ;;  %733 = vmatpush1.msra.mxu0 %v284_v17  ;;  %v504_v56 = vld [vmem:[%s1469_s7 + $0x6f0] sm:$0xff]  ;;  %v373_v57 = vld [vmem:[%s1469_s7 + $0x2d8] sm:$0xff] }
  0xb9   : > { %804 = vmatpush1.msra.mxu1 %v412_v18  ;;  %734 = vmatprep.subr.mxu0 %v409_v19  ;;  %v501_v58 = vld [vmem:[%s1469_s7 + $0x6d8] sm:$0xff]  ;;  %v372_v59 = vld [vmem:[%s1469_s7 + $0x2d0] sm:$0xff] }
  0xba   : > { %805 = vmatprep.subr.mxu1 %v537_v20  ;;  %735 = vmatpush2.msra.mxu0 %v408_v21  ;;  %v500_v60 = vld [vmem:[%s1469_s7 + $0x6d0] sm:$0xff]  ;;  %v369_v61 = vld [vmem:[%s1469_s7 + $0x2b8] sm:$0xff] }
  0xbb   : > { %806 = vmatpush2.msra.mxu1 %v536_v22  ;;  %736 = vmatprep.subr.mxu0 %v405_v23  ;;  %v497_v62 = vld [vmem:[%s1469_s7 + $0x6b8] sm:$0xff]  ;;  %v368_v0 = vld [vmem:[%s1469_s7 + $0x2b0] sm:$0xff] }
  0xbc   : > { %807 = vmatprep.subr.mxu1 %v533_v24  ;;  %737 = vmatpush2.msra.mxu0 %v404_v25  ;;  %v496_v1 = vld [vmem:[%s1469_s7 + $0x6b0] sm:$0xff]  ;;  %v365_v3 = vld [vmem:[%s1469_s7 + $0x298] sm:$0xff] }
  0xbd   : > { %808 = vmatpush2.msra.mxu1 %v532_v26  ;;  %738 = vmatprep.subr.mxu0 %v401_v27  ;;  %v493_v4 = vld [vmem:[%s1469_s7 + $0x698] sm:$0xff]  ;;  %v364_v5 = vld [vmem:[%s1469_s7 + $0x290] sm:$0xff] }
  0xbe   : > { %809 = vmatprep.subr.mxu1 %v529_v28  ;;  %739 = vmatpush2.msra.mxu0 %v400_v29  ;;  %v492_v6 = vld [vmem:[%s1469_s7 + $0x690] sm:$0xff]  ;;  %v361_v7 = vld [vmem:[%s1469_s7 + $0x278] sm:$0xff] }
  0xbf   : > { %810 = vmatpush2.msra.mxu1 %v528_v30  ;;  %740 = vmatprep.subr.mxu0 %v397_v31  ;;  %v489_v8 = vld [vmem:[%s1469_s7 + $0x678] sm:$0xff]  ;;  %v360_v10 = vld [vmem:[%s1469_s7 + $0x270] sm:$0xff] }
  0xc0   : > { %811 = vmatprep.subr.mxu1 %v525_v32  ;;  %741 = vmatpush2.msra.mxu0 %v396_v33  ;;  %v488_v12 = vld [vmem:[%s1469_s7 + $0x670] sm:$0xff]  ;;  %v357_v13 = vld [vmem:[%s1469_s7 + $0x258] sm:$0xff] }
  0xc1   : > { %812 = vmatpush2.msra.mxu1 %v524_v34  ;;  %742 = vmatprep.subr.mxu0 %v393_v35  ;;  %v485_v14 = vld [vmem:[%s1469_s7 + $0x658] sm:$0xff]  ;;  %v356_v15 = vld [vmem:[%s1469_s7 + $0x250] sm:$0xff] }
  0xc2   : > { %813 = vmatprep.subr.mxu1 %v521_v36  ;;  %743 = vmatpush2.msra.mxu0 %v392_v37  ;;  %v484_v16 = vld [vmem:[%s1469_s7 + $0x650] sm:$0xff]  ;;  %v353_v17 = vld [vmem:[%s1469_s7 + $0x238] sm:$0xff] }
  0xc3   : > { %814 = vmatpush2.msra.mxu1 %v520_v38  ;;  %744 = vmatprep.subr.mxu0 %v389_v39  ;;  %v481_v18 = vld [vmem:[%s1469_s7 + $0x638] sm:$0xff]  ;;  %v352_v19 = vld [vmem:[%s1469_s7 + $0x230] sm:$0xff]  ;;  %v280_v38 = vld [vmem:[#allocation2] sm:$0xff] }
  0xc4   : > { %815 = vmatprep.subr.mxu1 %v517_v40  ;;  %745 = vmatpush2.msra.mxu0 %v388_v41  ;;  %v480_v20 = vld [vmem:[%s1469_s7 + $0x630] sm:$0xff]  ;;  %v349_v21 = vld [vmem:[%s1469_s7 + $0x218] sm:$0xff] }
  0xc5   : > { %816 = vmatpush2.msra.mxu1 %v516_v42  ;;  %746 = vmatprep.subr.mxu0 %v385_v44  ;;  %v477_v22 = vld [vmem:[%s1469_s7 + $0x618] sm:$0xff]  ;;  %v348_v23 = vld [vmem:[%s1469_s7 + $0x210] sm:$0xff] }
  0xc6   : > { %817 = vmatprep.subr.mxu1 %v513_v45  ;;  %747 = vmatpush2.msra.mxu0 %v384_v46  ;;  %v476_v24 = vld [vmem:[%s1469_s7 + $0x610] sm:$0xff] }
  0xc7   : > { %818 = vmatpush2.msra.mxu1 %v512_v47  ;;  %748 = vmatprep.subr.mxu0 %v381_v48 }
  0xc8   : > { %819 = vmatprep.subr.mxu1 %v509_v49  ;;  %749 = vmatpush2.msra.mxu0 %v380_v50 }
  0xc9   : > { %820 = vmatpush2.msra.mxu1 %v508_v51  ;;  %750 = vmatprep.subr.mxu0 %v377_v52 }
  0xca   : > { %821 = vmatprep.subr.mxu1 %v505_v54  ;;  %751 = vmatpush2.msra.mxu0 %v376_v55 }
  0xcb   : > { %822 = vmatpush2.msra.mxu1 %v504_v56  ;;  %752 = vmatprep.subr.mxu0 %v373_v57 }
  0xcc   : > { %823 = vmatprep.subr.mxu1 %v501_v58  ;;  %753 = vmatpush2.msra.mxu0 %v372_v59 }
  0xcd   : > { %824 = vmatpush2.msra.mxu1 %v500_v60  ;;  %754 = vmatprep.subr.mxu0 %v369_v61 }
  0xce   : > { %825 = vmatprep.subr.mxu1 %v497_v62  ;;  %755 = vmatpush2.msra.mxu0 %v368_v0 }
  0xcf   : > { %826 = vmatpush2.msra.mxu1 %v496_v1  ;;  %756 = vmatprep.subr.mxu0 %v365_v3 }
  0xd0   : > { %827 = vmatprep.subr.mxu1 %v493_v4  ;;  %757 = vmatpush2.msra.mxu0 %v364_v5 }
  0xd1   : > { %828 = vmatpush2.msra.mxu1 %v492_v6  ;;  %758 = vmatprep.subr.mxu0 %v361_v7 }
  0xd2   : > { %829 = vmatprep.subr.mxu1 %v489_v8  ;;  %759 = vmatpush2.msra.mxu0 %v360_v10 }
  0xd3   : > { %830 = vmatpush2.msra.mxu1 %v488_v12  ;;  %760 = vmatprep.subr.mxu0 %v357_v13 }
  0xd4   : > { %831 = vmatprep.subr.mxu1 %v485_v14  ;;  %761 = vmatpush2.msra.mxu0 %v356_v15 }
  0xd5   : > { %832 = vmatpush2.msra.mxu1 %v484_v16  ;;  %762 = vmatprep.subr.mxu0 %v353_v17 }
  0xd6   : > { %833 = vmatprep.subr.mxu1 %v481_v18  ;;  %763 = vmatpush2.msra.mxu0 %v352_v19 }
  0xd7   : > { %834 = vmatpush2.msra.mxu1 %v480_v20  ;;  %764 = vmatprep.subr.mxu0 %v349_v21 }
  0xd8   : > { %835 = vmatprep.subr.mxu1 %v477_v22  ;;  %765 = vmatpush2.msra.mxu0 %v348_v23 }
  0xd9   : > { %766 = vmatprep.mubr.f32.mxu0 %v1620_v9  ;;  %836 = vmatpush2.msra.mxu1 %v476_v24 }
  0xda   : > { %837 = vmatprep.mubr.f32.mxu1 %v1625_v11  ;;  %767 = vmatmul.mubr.f32.vlgmr.msra.gmra.mxu0 %v1605_v63 }
  0xdb   : > { %838 = vmatmul.mubr.f32.vlgmr.msra.gmra.mxu1 %v1610_v2 }
 0x158   : > { %v626_v25 = vpop.f32.mrf.mxu0 }
 0x159   : > { %v697_v26 = vpop.f32.mrf.mxu1 }
 0x15a   : > { %v628_v27 = vpop.f32.mrf.mxu0  ;;  %v698_v29 = vadd.f32 %v697_v26, %v626_v25 }
 0x15b   : > { %v699_v28 = vpop.f32.mrf.mxu1 }
 0x15c   : > { %v700_v30 = vadd.f32 %v699_v28, %v628_v27 }
 0x15e   : > { %v848_v35 = vcombine.low %v698_v29, %v700_v30 }
 0x160   : > { %v856_v11 = vrot.slane %v848_v35, %v1594_v53 }
 0x19a   : > { %v768_v31 = vpop.f32.mrf.mxu0 }
 0x19b   : > { %v839_v32 = vpop.f32.mrf.mxu1 }
 0x19c   : > { %v770_v33 = vpop.f32.mrf.mxu0  ;;  %v840_v36 = vadd.f32 %v839_v32, %v768_v31 }
 0x19d   : > { %v841_v34 = vpop.f32.mrf.mxu1 }
 0x19e   : > { %v842_v9 = vadd.f32 %v841_v34, %v770_v33 }
 0x1a0   : > { %v849_v37 = vcombine.low %v840_v36, %v842_v9 }
 0x1a2   : > { %v863_v63 = vrot.slane %v849_v37, %v1594_v53 }
 0x1a4   : > { %v864_v2 = vcombine.low %v856_v11, %v863_v63  ;;  %871 = sbr.rel (%p1047_p12) target bundleno = 440 (0x1b8), region = 52 }
 0x1a6   : > { %v866_v39 = vadd.f32 %v864_v2, %v280_v38 }
 0x1a8   : > { %867 = vst [vmem:[#allocation2] sm:$0xff] %v866_v39 }
 0x1a9   : > { %v873_v40 = vld [vmem:[#allocation8] sm:$0xf]  ;;  %v877_v41 = vsub.s32 0, %v1582_v43  ;;  %v881_v42 = vsub.s32 1, %v1582_v43  ;;  %v885_v44 = vsub.s32 2, %v1582_v43  ;;  %v889_v45 = vsub.s32 3, %v1582_v43 }
 0x1ab   : > { %v878_v46 = vrot.slane %v873_v40, %v877_v41  ;;  %v882_v47 = vrot.slane %v873_v40, %v881_v42  ;;  %v886_v48 = vrot.slane %v873_v40, %v885_v44  ;;  %v890_v49 = vrot.slane %v873_v40, %v889_v45 }
 0x1ad   : > { %v891_v50 = vcombine.low %v878_v46, %v882_v47  ;;  %v892_v51 = vcombine.low %v886_v48, %v890_v49 }
 0x1af   : > { %v899_v52 = vrot.slane %v891_v50, %v1594_v53  ;;  %v906_v54 = vrot.slane %v892_v51, %v1594_v53  ;;  %v872_v55 = vld [vmem:[#allocation2] sm:$0xff] }
 0x1b1   : > { %v907_v56 = vcombine.low %v899_v52, %v906_v54 }
 0x1b3   : > { %v909_v57 = vadd.f32 %v907_v56, %v872_v55 }
 0x1b5   : > { %v910_v58 = vmax.f32 %v909_v57, 0.0 }
 0x1b7   : > { %911 = vst [vmem:[#allocation9] sm:$0xff] %v910_v58 }
 0x1b8 PF: > { %p1081_p13 = scmp.eq.s32.totalorder %s1365_s18, 1  ;;  %s1315_s15 = smov [#allocation9]  }
 0x1b9   : > { %s924_s20 = sshll.u32 %s1315_s15, 4  ;;  %s925_s20 = int_to_ptr.vmem [resolvable:$true] %s924_s20 }
 0x1ba   : > { %s1220_s21 = scalar_lea.vmem %s925_s20, 128  ;;  %p1227_p7 = scmp.lt.s32.totalorder %s925_s20, %s925_s20 }
 0x1bb   : > { %p1221_p1 = scmp.ne.s32.totalorder %s925_s20, %s1220_s21  ;;  %p1228_p0 = scmp.lt.s32.totalorder %s1220_s21, %s1220_s21 }
 0x1bd   : > { %p1222_p3 = pnand %p1221_p1, %p1081_p13  ;;  %p1229_p6 = por %p1228_p0, %p1227_p7 }
 0x1bf   : > { %p1223_p4 = pneg %p1222_p3 }
 0x1c1   : > { %p1230_p8 = pnand %p1229_p6, %p1223_p4 }
 0x1c3   : > { %1233 = shalt.err (!%p1230_p8)
}
 0x1c4   : > { %1064 = dma.vmem_to_hbm [thread:$0]  (%p1081_p13), %s925_s20, 128, %s1806_s3, [#allocation5]  }
 0x1c5   : > { %1281 = dma.done.wait (%p1081_p13), [#allocation5], 128  }
 0x1c6   : > { %1283 = vsyncadd (%p1081_p13), [#allocation5], 4294967168 }
 0x1c7 PF: > { %s20_s17 = sadd.s32 1, %s1306_s17   ;;  %s1820_s12 = smov %s1290_s13 }
 0x1c8   : > { %p17_p9 = scmp.ge.s32.totalorder %s20_s17, 4   ;;  %s1821_s13 = smov %s1294_s14 }
 0x1c9   : > { %s1822_s14 = smov %s1430_s11  ;;  %s1823_s15 = smov %s1302_s16 }
 0x1ca   : > { %s1824_s16 = smov %s1826_s25  ;;  %19 = sbr.rel (!%p17_p9) target bundleno = 7 (0x7), region = 96 }
 0x1cf   :  { %937 = vsyncpa [#allocation4], 1 }
 0x1d0   :  { %939 = vsyncpa [#allocation4 + $0x1], 1 }
 0x1d1   :  { %940 = vsyncpa [#allocation7], 1 }
 0x1d2   :  { %942 = vsyncpa [#allocation7 + $0x1], 1 }
 0x1d3   :  { %943 = vsyncpa [#allocation5], 1 }
 0x1d4   :  { %945 = vsyncpa [#allocation5 + $0x1], 1 }

</bundles_post_ra>
